<compile_context>
chip_gen: v7x
topology: tpu7x:2x2x1
jax: 0.10.0
libtpu: 0.0.40
codegen_flags: <defaults>
</compile_context>

<pallas_src>
import jax
import jax.numpy as jnp
from jax.experimental import pallas as pl
from jax.experimental.pallas import tpu as pltpu


def _round_up(x: int, m: int) -> int:
    return (x + m - 1) // m * m


def _mlp_kernel(x_ref, w1_ref, b1_ref, w2_ref, b2_ref, o_ref):
    # Layer 1: (TILE_B, D_in_pad) @ (D_in_pad, H_pad), bf16 operands, f32 acc.
    h = jnp.dot(x_ref[...], w1_ref[...], preferred_element_type=jnp.float32)
    h = h + b1_ref[...]                      # (1, H_pad) broadcasts over rows
    # Layer 2: (TILE_B, H_pad) @ (H_pad, D_out_pad), f32 (tiny, negligible cost).
    o = jnp.dot(h, w2_ref[...], preferred_element_type=jnp.float32)
    o_ref[...] = (o + b2_ref[...]).astype(o_ref.dtype)


def mnist_model_linear(x_nchw, w1, b1, w2, b2):
    """Forward pass of MNISTModelLinear.

    x_nchw : (B, C, H, W) float32
    w1     : (D_in, hidden)  float32   (PyTorch layer1.weight.T)
    b1     : (hidden,)       float32
    w2     : (hidden, D_out) float32   (PyTorch layer2.weight.T)
    b2     : (D_out,)        float32
    returns: (B, D_out)      float32
    """
    B = x_nchw.shape[0]
    d_in, hidden = w1.shape
    d_out = w2.shape[1]

    # nn.Flatten(): (B, C, H, W) -> (B, C*H*W)   (glue, plain JAX)
    x_flat = x_nchw.reshape(B, -1).astype(jnp.float32)
    assert x_flat.shape[1] == d_in

    # ---- Lane / sublane dense padding ---------------------------------------
    d_in_pad = _round_up(d_in, 128)               # 256 -> 256
    hid_pad = _round_up(hidden, 128)              # 128 -> 128
    d_out_pad = _round_up(max(d_out, 128), 128)   # 10  -> 128 (unmasked stores)

    b_pad128 = _round_up(max(B, 128), 128)        # fill the MXU M dimension
    tile_b = min(b_pad128, 512)                   # 512-row tiles once B scales
    b_pad = _round_up(max(B, tile_b), tile_b)

    # Zero padding is exact: padded x columns meet zero W1 rows, padded hidden
    # lanes (zero bias, zero W1 cols) meet zero W2 rows, padded output lanes
    # stay zero and are sliced off below.
    x_p = jnp.zeros((b_pad, d_in_pad), jnp.bfloat16).at[:B, :d_in].set(
        x_flat.astype(jnp.bfloat16))
    w1_p = jnp.zeros((d_in_pad, hid_pad), jnp.bfloat16).at[:d_in, :hidden].set(
        w1.astype(jnp.bfloat16))
    b1_p = jnp.zeros((1, hid_pad), jnp.float32).at[0, :hidden].set(
        b1.astype(jnp.float32))
    w2_p = jnp.zeros((hid_pad, d_out_pad), jnp.float32).at[:hidden, :d_out].set(
        w2.astype(jnp.float32))
    b2_p = jnp.zeros((1, d_out_pad), jnp.float32).at[0, :d_out].set(
        b2.astype(jnp.float32))

    grid = (b_pad // tile_b,)
    cost = pl.CostEstimate(
        flops=2 * b_pad * (d_in_pad * hid_pad + hid_pad * d_out_pad),
        transcendentals=0,
        bytes_accessed=(x_p.size * 2 + w1_p.size * 2
                        + (b1_p.size + w2_p.size + b2_p.size) * 4
                        + b_pad * d_out_pad * 4),
    )

    out_padded = pl.pallas_call(
        _mlp_kernel,
        out_shape=jax.ShapeDtypeStruct((b_pad, d_out_pad), jnp.float32),
        grid_spec=pltpu.PrefetchScalarGridSpec(
            num_scalar_prefetch=0,
            grid=grid,
            in_specs=[
                # x: one batch tile per grid step (double-buffered by Pallas)
                pl.BlockSpec((tile_b, d_in_pad), lambda i: (i, 0)),
                # weights / biases: resident across all grid steps
                pl.BlockSpec((d_in_pad, hid_pad), lambda i: (0, 0)),
                pl.BlockSpec((1, hid_pad), lambda i: (0, 0)),
                pl.BlockSpec((hid_pad, d_out_pad), lambda i: (0, 0)),
                pl.BlockSpec((1, d_out_pad), lambda i: (0, 0)),
            ],
            out_specs=pl.BlockSpec((tile_b, d_out_pad), lambda i: (i, 0)),
        ),
        compiler_params=pltpu.CompilerParams(
            # Independent batch tiles -> shard across TensorCores (v7x megacore).
            dimension_semantics=("parallel",),
        ),
        cost_estimate=cost,
    )(x_p, w1_p, b1_p, w2_p, b2_p)

    # Strip batch and output-feature padding.
    return out_padded[:B, :d_out]


if __name__ == "__main__":
    # Small shapes consistent with the module: 1x16x16 "image", hidden=128,
    # 10 output classes, batch of 8.
    B, C, H, W = 8, 1, 16, 16
    input_layer = C * H * W          # 256
    hidden_layer = 128
    output_layer = 10

    key = jax.random.PRNGKey(0)
    kx, kw1, kb1, kw2, kb2 = jax.random.split(key, 5)

    x = jax.random.normal(kx, (B, C, H, W), dtype=jnp.float32)

    # Deterministic init mimicking PyTorch's default U(-1/sqrt(fan_in), 1/sqrt(fan_in)).
    s1 = 1.0 / jnp.sqrt(jnp.float32(input_layer))
    s2 = 1.0 / jnp.sqrt(jnp.float32(hidden_layer))
    w1 = jax.random.uniform(kw1, (input_layer, hidden_layer), jnp.float32, -s1, s1)
    b1 = jax.random.uniform(kb1, (hidden_layer,), jnp.float32, -s1, s1)
    w2 = jax.random.uniform(kw2, (hidden_layer, output_layer), jnp.float32, -s2, s2)
    b2 = jax.random.uniform(kb2, (output_layer,), jnp.float32, -s2, s2)

    out = mnist_model_linear(x, w1, b1, w2, b2)
    out = jax.block_until_ready(out)
    assert out.shape == (B, output_layer)

    # Full-precision two-layer reference (exactly the PyTorch module's math).
    ref = (x.reshape(B, -1) @ w1 + b1) @ w2 + b2
    # Layer-1 operands are bf16 (f32 accumulate), so compare at bf16 tolerance.
    max_err = float(jnp.max(jnp.abs(out - ref)))
    assert jnp.allclose(out, ref, atol=2e-2, rtol=2e-2), f"max_err={max_err}"

    print("KERNEL_OK")
</pallas_src>

<mosaic_0001>
module attributes {stable_mosaic.version = 11 : i64} {
  func.func @_mlp_kernel(%arg0: i32, %arg1: memref<128x256xbf16, #tpu.memory_space<vmem>>, %arg2: memref<256x128xbf16, #tpu.memory_space<vmem>>, %arg3: memref<1x128xf32, #tpu.memory_space<vmem>>, %arg4: memref<128x128xf32, #tpu.memory_space<vmem>>, %arg5: memref<1x128xf32, #tpu.memory_space<vmem>>, %arg6: memref<128x128xf32, #tpu.memory_space<vmem>>) attributes {dimension_semantics = [#tpu.dimension_semantics<parallel>], iteration_bounds = array<i64: 1>, scalar_prefetch = 0 : i64, scratch_operands = 0 : i64, tpu.core_type = #tpu.core_type<tc>, window_params = [{transform_indices = @transform_0, window_bounds = array<i64: 128, 256>}, {pipeline_mode = #tpu.pipeline_mode<synchronous>, transform_indices = @transform_1, window_bounds = array<i64: 256, 128>}, {pipeline_mode = #tpu.pipeline_mode<synchronous>, transform_indices = @transform_2, window_bounds = array<i64: 1, 128>}, {pipeline_mode = #tpu.pipeline_mode<synchronous>, transform_indices = @transform_3, window_bounds = array<i64: 128, 128>}, {pipeline_mode = #tpu.pipeline_mode<synchronous>, transform_indices = @transform_4, window_bounds = array<i64: 1, 128>}, {transform_indices = @transform_5, window_bounds = array<i64: 128, 128>}]} {
    %c0 = arith.constant 0 : index
    %c0_0 = arith.constant 0 : index
    %0 = vector.load %arg1[%c0, %c0_0] : memref<128x256xbf16, #tpu.memory_space<vmem>>, vector<128x256xbf16>
    %c0_1 = arith.constant 0 : index
    %c0_2 = arith.constant 0 : index
    %1 = vector.load %arg2[%c0_1, %c0_2] : memref<256x128xbf16, #tpu.memory_space<vmem>>, vector<256x128xbf16>
    %cst = arith.constant dense<0.000000e+00> : vector<128x128xf32>
    %2 = tpu.matmul %0, %1, %cst {dimension_numbers = #tpu.dot_dimension_numbers<[1], [0], [0], [1], [0, 0, 1, 1], [], []>} : vector<128x256xbf16>, vector<256x128xbf16>, vector<128x128xf32> -> vector<128x128xf32>
    %c0_3 = arith.constant 0 : index
    %c0_4 = arith.constant 0 : index
    %3 = vector.load %arg3[%c0_3, %c0_4] : memref<1x128xf32, #tpu.memory_space<vmem>>, vector<1x128xf32>
    %4 = vector.broadcast %3 : vector<1x128xf32> to vector<128x128xf32>
    %5 = arith.addf %2, %4 : vector<128x128xf32>
    %c0_5 = arith.constant 0 : index
    %c0_6 = arith.constant 0 : index
    %6 = vector.load %arg4[%c0_5, %c0_6] : memref<128x128xf32, #tpu.memory_space<vmem>>, vector<128x128xf32>
    %cst_7 = arith.constant dense<0.000000e+00> : vector<128x128xf32>
    %7 = tpu.matmul %5, %6, %cst_7 {dimension_numbers = #tpu.dot_dimension_numbers<[1], [0], [0], [1], [0, 0, 1, 1], [], []>} : vector<128x128xf32>, vector<128x128xf32>, vector<128x128xf32> -> vector<128x128xf32>
    %c0_8 = arith.constant 0 : index
    %c0_9 = arith.constant 0 : index
    %8 = vector.load %arg5[%c0_8, %c0_9] : memref<1x128xf32, #tpu.memory_space<vmem>>, vector<1x128xf32>
    %9 = vector.broadcast %8 : vector<1x128xf32> to vector<128x128xf32>
    %10 = arith.addf %7, %9 : vector<128x128xf32>
    %c0_10 = arith.constant 0 : index
    %c0_11 = arith.constant 0 : index
    %11 = vector.load %arg6[%c0_10, %c0_11] : memref<128x128xf32, #tpu.memory_space<vmem>>, vector<128x128xf32>
    tpu.vector_store %arg6[%c0_10, %c0_11], %10 {strides = array<i32>} : memref<128x128xf32, #tpu.memory_space<vmem>>, vector<128x128xf32>,
    return
  }
  func.func @transform_0(%arg0: i32) -> (i32, i32) {
    %c0_i32 = arith.constant 0 : i32
    %c0_i32_0 = arith.constant 0 : i32
    return %arg0, %c0_i32 : i32, i32
  }
  func.func @transform_1(%arg0: i32) -> (i32, i32) {
    %c0_i32 = arith.constant 0 : i32
    %c0_i32_0 = arith.constant 0 : i32
    %c0_i32_1 = arith.constant 0 : i32
    return %c0_i32, %c0_i32_0 : i32, i32
  }
  func.func @transform_2(%arg0: i32) -> (i32, i32) {
    %c0_i32 = arith.constant 0 : i32
    %c0_i32_0 = arith.constant 0 : i32
    %c0_i32_1 = arith.constant 0 : i32
    return %c0_i32, %c0_i32_0 : i32, i32
  }
  func.func @transform_3(%arg0: i32) -> (i32, i32) {
    %c0_i32 = arith.constant 0 : i32
    %c0_i32_0 = arith.constant 0 : i32
    %c0_i32_1 = arith.constant 0 : i32
    return %c0_i32, %c0_i32_0 : i32, i32
  }
  func.func @transform_4(%arg0: i32) -> (i32, i32) {
    %c0_i32 = arith.constant 0 : i32
    %c0_i32_0 = arith.constant 0 : i32
    %c0_i32_1 = arith.constant 0 : i32
    return %c0_i32, %c0_i32_0 : i32, i32
  }
  func.func @transform_5(%arg0: i32) -> (i32, i32) {
    %c0_i32 = arith.constant 0 : i32
    %c0_i32_0 = arith.constant 0 : i32
    return %arg0, %c0_i32 : i32, i32
  }
}

</mosaic_0001>

<bundles_post_ra>
// kernel: tpu_custom_call.1
= control target key start
LH: loop header
LB: loop body
LE: loop exit
PB: predicated region body
PF: predicated region fallthrough
CT: control target
= control target key end

     0   :  { %10 = vsyncpa [#allocation3], 0  ;;  %s1072_s0 = inlined_call_operand.hbm [shape: bf16[128,256], index: 0, kind: input, shape index: {}]   ;;  %s1073_s1 = inlined_call_operand.hbm [shape: bf16[256,128], index: 1, kind: input, shape index: {}]   ;;  %s1074_s2 = inlined_call_operand.vmem [shape: f32[1,128], index: 2, kind: input, shape index: {}]   ;;  %s1075_s3 = inlined_call_operand.hbm [shape: f32[128,128], index: 3, kind: input, shape index: {}]   ;;  %s1076_s4 = inlined_call_operand.vmem [shape: f32[1,128], index: 4, kind: input, shape index: {}]   ;;  %s1077_s5 = inlined_call_operand.hbm [shape: f32[128,128], index: 5, kind: output, shape index: {}]  }
   0x1   :  { %11 = vsyncpa [#allocation6], 0 }
   0x2   :  { %12 = vsyncpa [#allocation4], 0  ;;  %s953_s18 = smov [#allocation5]   ;;  %s859_s22 = scalar_lea.hbm %s1073_s1, 2048 }
   0x3   :  { %s30_s19 = sshll.u32 %s953_s18, 4  ;;  %p860_p0 = scmp.ne.s32.totalorder %s1073_s1, %s859_s22  ;;  %s31_s19 = int_to_ptr.vmem [resolvable:$true] %s30_s19 }
   0x4   :  { %p863_p1 = scmp.lt.u32.totalorder %s859_s22, %s1073_s1 }
   0x6   :  { %p865_p2 = pnand %p863_p1, %p860_p0 }
   0x8   :  { %868 = shalt.err (!%p865_p2)
}
   0x9   :  { %s869_s27 = scalar_lea.vmem %s31_s19, 2048  ;;  %p874_p4 = scmp.lt.s32.totalorder %s31_s19, %s31_s19 }
   0xa   :  { %p870_p3 = scmp.ne.s32.totalorder %s31_s19, %s869_s27  ;;  %p875_p5 = scmp.lt.s32.totalorder %s869_s27, %s869_s27 }
   0xc   :  { %p876_p6 = por %p875_p5, %p874_p4 }
   0xe   :  { %p877_p7 = pnand %p876_p6, %p870_p3 }
  0x10   :  { %880 = shalt.err (!%p877_p7)
}
  0x11   :  { %s954_s28 = smov 64   ;;  %s955_s29 = smov 4  }
  0x12   :  { %36 = dma.hbm_to_vmem [thread:$0]  %s1073_s1, 2048, %s31_s19, [#allocation6], %s954_s28, %s954_s28, %s955_s29  }
  0x13   :  { %s956_s7 = smov [#allocation2]   ;;  %s881_s11 = scalar_lea.hbm %s1072_s0, 2048 }
  0x14   :  { %s18_s8 = sshll.u32 %s956_s7, 4  ;;  %p882_p8 = scmp.ne.s32.totalorder %s1072_s0, %s881_s11  ;;  %s19_s8 = int_to_ptr.vmem [resolvable:$true] %s18_s8 }
  0x15   :  { %p885_p9 = scmp.lt.u32.totalorder %s881_s11, %s1072_s0 }
  0x17   :  { %p887_p10 = pnand %p885_p9, %p882_p8 }
  0x19   :  { %890 = shalt.err (!%p887_p10)
}
  0x1a   :  { %s891_s16 = scalar_lea.vmem %s19_s8, 2048  ;;  %p896_p12 = scmp.lt.s32.totalorder %s19_s8, %s19_s8 }
  0x1b   :  { %p892_p11 = scmp.ne.s32.totalorder %s19_s8, %s891_s16  ;;  %p897_p13 = scmp.lt.s32.totalorder %s891_s16, %s891_s16 }
  0x1d   :  { %p898_p0 = por %p897_p13, %p896_p12 }
  0x1f   :  { %p899_p1 = pnand %p898_p0, %p892_p11 }
  0x21   :  { %902 = shalt.err (!%p899_p1)
}
  0x22   :  { %s957_s1 = smov 128   ;;  %s958_s17 = smov 8  }
  0x23   :  { %24 = dma.hbm_to_vmem [thread:$0]  %s1072_s0, 2048, %s19_s8, [#allocation3], %s957_s1, %s957_s1, %s958_s17  }
  0x24   :  { %s959_s20 = smov [#allocation7]   ;;  %s903_s24 = scalar_lea.hbm %s1075_s3, 2048 }
  0x25   :  { %s44_s21 = sshll.u32 %s959_s20, 4  ;;  %p904_p2 = scmp.ne.s32.totalorder %s1075_s3, %s903_s24  ;;  %s45_s21 = int_to_ptr.vmem [resolvable:$true] %s44_s21 }
  0x26   :  { %p907_p3 = scmp.lt.u32.totalorder %s903_s24, %s1075_s3 }
  0x28   :  { %p909_p4 = pnand %p907_p3, %p904_p2 }
  0x2a   :  { %912 = shalt.err (!%p909_p4)
}
  0x2b   :  { %s913_s29 = scalar_lea.vmem %s45_s21, 2048  ;;  %p918_p6 = scmp.lt.s32.totalorder %s45_s21, %s45_s21 }
  0x2c   :  { %p914_p5 = scmp.ne.s32.totalorder %s45_s21, %s913_s29  ;;  %p919_p7 = scmp.lt.s32.totalorder %s913_s29, %s913_s29 }
  0x2e   :  { %p920_p8 = por %p919_p7, %p918_p6 }
  0x30   :  { %p921_p9 = pnand %p920_p8, %p914_p5 }
  0x32   :  { %924 = shalt.err (!%p921_p9)
}
  0x33   :  { %50 = dma.hbm_to_vmem [thread:$0]  %s1075_s3, 2048, %s45_s21, [#allocation6], %s957_s1, %s957_s1, %s958_s17  }
  0x34   :  { %947 = dma.done.wait [#allocation3], 2048  }
  0x35   :  { %948 = vsyncadd [#allocation3], 4294965248 }
  0x36   :  { %949 = dma.done.wait [#allocation6], 4096  }
  0x37   :  { %950 = vsyncadd [#allocation6], 4294963200  ;;  %v819_v0 = vld [vmem:[#allocation5 + $0x40] sm:$0xff]   ;;  %v821_v2 = vld [vmem:[#allocation5 + $0x48] sm:$0xff]  }
  0x38   :  { %v820_v1 = vld [vmem:[#allocation5] sm:$0xff]   ;;  %627 = vmatprep.subr.bf16.mxu0 %v819_v0  ;;  %v822_v3 = vld [vmem:[#allocation5 + $0x8] sm:$0xff]   ;;  %v823_v4 = vld [vmem:[#allocation5 + $0x50] sm:$0xff]  }
  0x39   :  { %628 = vmatpush3.bf16.msra.mxu0 %v820_v1  ;;  %v824_v5 = vld [vmem:[#allocation5 + $0x10] sm:$0xff]   ;;  %v825_v6 = vld [vmem:[#allocation5 + $0x58] sm:$0xff]   ;;  %v827_v8 = vld [vmem:[#allocation5 + $0x60] sm:$0xff]  }
  0x3a   :  { %629 = vmatprep.subr.bf16.mxu0 %v821_v2  ;;  %v826_v7 = vld [vmem:[#allocation5 + $0x18] sm:$0xff]   ;;  %v828_v9 = vld [vmem:[#allocation5 + $0x20] sm:$0xff]   ;;  %v829_v10 = vld [vmem:[#allocation5 + $0x68] sm:$0xff]  }
  0x3b   :  { %v837_v11 = vld [vmem:[#allocation2 + $0x4] ss:$8 sps:$4 sm:$0xff]   ;;  %v831_v13 = vld [vmem:[#allocation5 + $0x70] sm:$0xff]   ;;  %v833_v15 = vld [vmem:[#allocation5 + $0x78] sm:$0xff]  }
  0x3c   :  { %v830_v12 = vld [vmem:[#allocation5 + $0x28] sm:$0xff]   ;;  %326 = vmatprep.mubr.bf16.mxu0 %v837_v11  ;;  %v832_v14 = vld [vmem:[#allocation5 + $0x30] sm:$0xff]   ;;  %v834_v16 = vld [vmem:[#allocation5 + $0x38] sm:$0xff]  }
  0x3d   :  { %630 = vmatpush3.bf16.msra.mxu0 %v822_v3  ;;  %v391_v17 = vld [vmem:[#allocation7] sm:$0xff]  ;;  %v392_v18 = vld [vmem:[#allocation7 + $0x8] sm:$0xff]  ;;  %v393_v19 = vld [vmem:[#allocation7 + $0x10] sm:$0xff] }
  0x3e   :  { %631 = vmatprep.subr.bf16.mxu0 %v823_v4  ;;  %v394_v20 = vld [vmem:[#allocation7 + $0x18] sm:$0xff]  ;;  %v779_v21 = vpack.c.bf16 %v392_v18, %v391_v17  ;;  %v395_v23 = vld [vmem:[#allocation7 + $0x20] sm:$0xff]  ;;  %v396_v24 = vld [vmem:[#allocation7 + $0x28] sm:$0xff] }
  0x3f   :  { %v783_v22 = vpack.c.bf16 %v394_v20, %v393_v19  ;;  %v835_v25 = vld [vmem:[#allocation2] ss:$8 sps:$4 sm:$0xff]   ;;  %v838_v26 = vld [vmem:[#allocation2 + $0x14] ss:$8 sps:$4 sm:$0xff]   ;;  %v787_v27 = vpack.c.bf16 %v396_v24, %v395_v23  ;;  %v840_v33 = vld [vmem:[#allocation2 + $0x10] ss:$8 sps:$4 sm:$0xff]  }
  0x40   :  { %780 = vmatprep.subr.bf16.mxu1 %v779_v21  ;;  %v397_v28 = vld [vmem:[#allocation7 + $0x30] sm:$0xff]  ;;  %v398_v29 = vld [vmem:[#allocation7 + $0x38] sm:$0xff]  ;;  %v399_v31 = vld [vmem:[#allocation7 + $0x40] sm:$0xff] }
  0x41   :  { %632 = vmatpush3.bf16.msra.mxu0 %v824_v5  ;;  %782 = vmatpush3.bf16.msra.mxu1 %v779_v21  ;;  %v791_v30 = vpack.c.bf16 %v398_v29, %v397_v28  ;;  %v400_v32 = vld [vmem:[#allocation7 + $0x48] sm:$0xff]  ;;  %v401_v36 = vld [vmem:[#allocation7 + $0x50] sm:$0xff]  ;;  %v402_v37 = vld [vmem:[#allocation7 + $0x58] sm:$0xff] }
  0x42   :  { %633 = vmatprep.subr.bf16.mxu0 %v825_v6  ;;  %784 = vmatprep.subr.bf16.mxu1 %v783_v22  ;;  %v841_v34 = vld [vmem:[#allocation2 + $0x24] ss:$8 sps:$4 sm:$0xff]   ;;  %v795_v35 = vpack.c.bf16 %v400_v32, %v399_v31  ;;  %v799_v38 = vpack.c.bf16 %v402_v37, %v401_v36  ;;  %v843_v39 = vld [vmem:[#allocation2 + $0x20] ss:$8 sps:$4 sm:$0xff]   ;;  %v844_v40 = vld [vmem:[#allocation2 + $0x34] ss:$8 sps:$4 sm:$0xff]  }
  0x43   :  { %v846_v41 = vld [vmem:[#allocation2 + $0x30] ss:$8 sps:$4 sm:$0xff]   ;;  %v847_v42 = vld [vmem:[#allocation2 + $0x44] ss:$8 sps:$4 sm:$0xff]   ;;  %v849_v43 = vld [vmem:[#allocation2 + $0x40] ss:$8 sps:$4 sm:$0xff]  }
  0x44   :  { %v850_v44 = vld [vmem:[#allocation2 + $0x54] ss:$8 sps:$4 sm:$0xff]   ;;  %v852_v45 = vld [vmem:[#allocation2 + $0x50] ss:$8 sps:$4 sm:$0xff]   ;;  %v853_v46 = vld [vmem:[#allocation2 + $0x64] ss:$8 sps:$4 sm:$0xff]  }
  0x45   :  { %634 = vmatpush3.bf16.msra.mxu0 %v826_v7  ;;  %786 = vmatpush3.bf16.msra.mxu1 %v783_v22  ;;  %v855_v47 = vld [vmem:[#allocation2 + $0x60] ss:$8 sps:$4 sm:$0xff]   ;;  %v856_v48 = vld [vmem:[#allocation2 + $0x74] ss:$8 sps:$4 sm:$0xff]   ;;  %v858_v49 = vld [vmem:[#allocation2 + $0x70] ss:$8 sps:$4 sm:$0xff]  }
  0x46   :  { %635 = vmatprep.subr.bf16.mxu0 %v827_v8  ;;  %788 = vmatprep.subr.bf16.mxu1 %v787_v27  ;;  %v403_v50 = vld [vmem:[#allocation7 + $0x60] sm:$0xff]  ;;  %v404_v51 = vld [vmem:[#allocation7 + $0x68] sm:$0xff]  ;;  %v405_v53 = vld [vmem:[#allocation7 + $0x70] sm:$0xff] }
  0x47   :  { %v803_v52 = vpack.c.bf16 %v404_v51, %v403_v50  ;;  %v406_v54 = vld [vmem:[#allocation7 + $0x78] sm:$0xff]  ;;  %v1036_v58 = vld [vmem:[%s1074_s2] ss:$0 sm:$0xff] }
  0x48   :  { %v807_v55 = vpack.c.bf16 %v406_v54, %v405_v53 }
  0x49   :  { %636 = vmatpush3.bf16.msra.mxu0 %v828_v9  ;;  %790 = vmatpush3.bf16.msra.mxu1 %v787_v27 }
  0x4a   :  { %637 = vmatprep.subr.bf16.mxu0 %v829_v10  ;;  %792 = vmatprep.subr.bf16.mxu1 %v791_v30 }
  0x4d   :  { %638 = vmatpush3.bf16.msra.mxu0 %v830_v12  ;;  %794 = vmatpush3.bf16.msra.mxu1 %v791_v30 }
  0x4e   :  { %639 = vmatprep.subr.bf16.mxu0 %v831_v13  ;;  %796 = vmatprep.subr.bf16.mxu1 %v795_v35 }
  0x51   :  { %640 = vmatpush3.bf16.msra.mxu0 %v832_v14  ;;  %798 = vmatpush3.bf16.msra.mxu1 %v795_v35 }
  0x52   :  { %641 = vmatprep.subr.bf16.mxu0 %v833_v15  ;;  %800 = vmatprep.subr.bf16.mxu1 %v799_v38 }
  0x55   :  { %642 = vmatpush3.bf16.msra.mxu0 %v834_v16  ;;  %802 = vmatpush3.bf16.msra.mxu1 %v799_v38 }
  0x56   :  { %804 = vmatprep.subr.bf16.mxu1 %v803_v52 }
  0x58   :  { %327 = vmatmul.mubr.bf16.vlgmr.msra.gmra.mrb[0].mxu0 %v835_v25 }
  0x59   :  { %334 = vmatprep.mubr.bf16.mxu0 %v838_v26  ;;  %806 = vmatpush3.bf16.msra.mxu1 %v803_v52 }
  0x5a   :  { %808 = vmatprep.subr.bf16.mxu1 %v807_v55 }
  0x5d   :  { %810 = vmatpush3.bf16.msra.mxu1 %v807_v55 }
  0x60   :  { %335 = vmatmul.mubr.bf16.gmra.mrb[4].mxu0 %v840_v33 }
  0x61   :  { %342 = vmatprep.mubr.bf16.mxu0 %v841_v34 }
  0x68   :  { %343 = vmatmul.mubr.bf16.gmra.mrb[8].mxu0 %v843_v39 }
  0x69   :  { %350 = vmatprep.mubr.bf16.mxu0 %v844_v40 }
  0x70   :  { %351 = vmatmul.mubr.bf16.gmra.mrb[12].mxu0 %v846_v41 }
  0x71   :  { %358 = vmatprep.mubr.bf16.mxu0 %v847_v42 }
  0x78   :  { %359 = vmatmul.mubr.bf16.gmra.mrb[16].mxu0 %v849_v43 }
  0x79   :  { %366 = vmatprep.mubr.bf16.mxu0 %v850_v44 }
  0x80   :  { %367 = vmatmul.mubr.bf16.gmra.mrb[20].mxu0 %v852_v45 }
  0x81   :  { %374 = vmatprep.mubr.bf16.mxu0 %v853_v46 }
  0x88   :  { %375 = vmatmul.mubr.bf16.gmra.mrb[24].mxu0 %v855_v47 }
  0x89   :  { %382 = vmatprep.mubr.bf16.mxu0 %v856_v48 }
  0x90   :  { %383 = vmatmul.mubr.bf16.gmra.mrb[28].mxu0 %v858_v49 }
 0x12b   :  { %v643_v56 = vpop.f32.mrb[0].mxu0 }
 0x12c   :  { %v644_v57 = vpop.f32.mrb[1].mxu0 }
 0x12d   :  { %v645_v59 = vadd.f32 %v644_v57, %v643_v56  ;;  %v646_v60 = vpop.f32.mrb[2].mxu0  ;;  %v626_v57 = vld [vmem:[%s1076_s4] ss:$0 sm:$0xff]  ;;  %s960_s4 = smov [#allocation8]  }
 0x12e   :  { %v647_v61 = vpop.f32.mrb[3].mxu0  ;;  %s580_s8 = sshll.u32 %s960_s4, 4  ;;  %s581_s8 = int_to_ptr.vmem [resolvable:$true] %s580_s8 }
 0x12f   :  { %v648_v62 = vadd.f32 %v647_v61, %v646_v60  ;;  %v329_v63 = vadd.f32 %v645_v59, %v1036_v58  ;;  %s925_s9 = scalar_lea.vmem %s581_s8, 2048  ;;  %p930_p11 = scmp.lt.s32.totalorder %s581_s8, %s581_s8 }
 0x130   :  { %p926_p10 = scmp.ne.s32.totalorder %s581_s8, %s925_s9  ;;  %p931_p12 = scmp.lt.s32.totalorder %s925_s9, %s925_s9 }
 0x131   :  { %v332_v0 = vadd.f32 %v648_v62, %v1036_v58  ;;  %755 = vmatprep.mubr.f32.mxu1 %v329_v63 }
 0x132   :  { %p932_p13 = por %p931_p12, %p930_p11 }
 0x133   :  { %v649_v1 = vpop.f32.mrb[4].mxu0  ;;  %756 = vmatmul.mubr.f32.vlgmr.msra.gmra.mrb[0].mxu1 %v332_v0 }
 0x134   :  { %v650_v2 = vpop.f32.mrb[5].mxu0  ;;  %p933_p0 = pnand %p932_p13, %p926_p10 }
 0x135   :  { %v651_v3 = vadd.f32 %v650_v2, %v649_v1  ;;  %v652_v4 = vpop.f32.mrb[6].mxu0 }
 0x136   :  { %v653_v5 = vpop.f32.mrb[7].mxu0 }
 0x137   :  { %v337_v6 = vadd.f32 %v651_v3, %v1036_v58  ;;  %v654_v7 = vadd.f32 %v653_v5, %v652_v4 }
 0x139   :  { %v340_v8 = vadd.f32 %v654_v7, %v1036_v58  ;;  %758 = vmatprep.mubr.f32.mxu1 %v337_v6 }
 0x13b   :  { %v655_v9 = vpop.f32.mrb[8].mxu0  ;;  %759 = vmatmul.mubr.f32.gmra.mrb[2].mxu1 %v340_v8 }
 0x13c   :  { %v656_v10 = vpop.f32.mrb[9].mxu0 }
 0x13d   :  { %v657_v11 = vadd.f32 %v656_v10, %v655_v9  ;;  %v658_v12 = vpop.f32.mrb[10].mxu0 }
 0x13e   :  { %v659_v13 = vpop.f32.mrb[11].mxu0 }
 0x13f   :  { %v345_v14 = vadd.f32 %v657_v11, %v1036_v58  ;;  %v660_v15 = vadd.f32 %v659_v13, %v658_v12 }
 0x141   :  { %v348_v16 = vadd.f32 %v660_v15, %v1036_v58  ;;  %761 = vmatprep.mubr.f32.mxu1 %v345_v14 }
 0x143   :  { %v661_v17 = vpop.f32.mrb[12].mxu0  ;;  %762 = vmatmul.mubr.f32.gmra.mrb[4].mxu1 %v348_v16 }
 0x144   :  { %v662_v18 = vpop.f32.mrb[13].mxu0 }
 0x145   :  { %v663_v19 = vadd.f32 %v662_v18, %v661_v17  ;;  %v664_v20 = vpop.f32.mrb[14].mxu0 }
 0x146   :  { %v665_v21 = vpop.f32.mrb[15].mxu0 }
 0x147   :  { %v353_v22 = vadd.f32 %v663_v19, %v1036_v58  ;;  %v666_v23 = vadd.f32 %v665_v21, %v664_v20 }
 0x149   :  { %v356_v24 = vadd.f32 %v666_v23, %v1036_v58  ;;  %764 = vmatprep.mubr.f32.mxu1 %v353_v22 }
 0x14b   :  { %v667_v25 = vpop.f32.mrb[16].mxu0  ;;  %765 = vmatmul.mubr.f32.gmra.mrb[6].mxu1 %v356_v24 }
 0x14c   :  { %v668_v26 = vpop.f32.mrb[17].mxu0 }
 0x14d   :  { %v669_v27 = vadd.f32 %v668_v26, %v667_v25  ;;  %v670_v28 = vpop.f32.mrb[18].mxu0 }
 0x14e   :  { %v671_v29 = vpop.f32.mrb[19].mxu0 }
 0x14f   :  { %v361_v30 = vadd.f32 %v669_v27, %v1036_v58  ;;  %v672_v31 = vadd.f32 %v671_v29, %v670_v28 }
 0x151   :  { %v364_v32 = vadd.f32 %v672_v31, %v1036_v58  ;;  %767 = vmatprep.mubr.f32.mxu1 %v361_v30 }
 0x153   :  { %v673_v33 = vpop.f32.mrb[20].mxu0  ;;  %768 = vmatmul.mubr.f32.gmra.mrb[8].mxu1 %v364_v32 }
 0x154   :  { %v674_v34 = vpop.f32.mrb[21].mxu0 }
 0x155   :  { %v675_v35 = vadd.f32 %v674_v34, %v673_v33  ;;  %v676_v36 = vpop.f32.mrb[22].mxu0 }
 0x156   :  { %v677_v37 = vpop.f32.mrb[23].mxu0 }
 0x157   :  { %v369_v38 = vadd.f32 %v675_v35, %v1036_v58  ;;  %v678_v39 = vadd.f32 %v677_v37, %v676_v36 }
 0x159   :  { %v372_v40 = vadd.f32 %v678_v39, %v1036_v58  ;;  %770 = vmatprep.mubr.f32.mxu1 %v369_v38 }
 0x15b   :  { %v679_v41 = vpop.f32.mrb[24].mxu0  ;;  %771 = vmatmul.mubr.f32.gmra.mrb[10].mxu1 %v372_v40 }
 0x15c   :  { %v680_v42 = vpop.f32.mrb[25].mxu0 }
 0x15d   :  { %v681_v43 = vadd.f32 %v680_v42, %v679_v41  ;;  %v682_v44 = vpop.f32.mrb[26].mxu0 }
 0x15e   :  { %v683_v45 = vpop.f32.mrb[27].mxu0 }
 0x15f   :  { %v377_v46 = vadd.f32 %v681_v43, %v1036_v58  ;;  %v684_v47 = vadd.f32 %v683_v45, %v682_v44 }
 0x161   :  { %v380_v48 = vadd.f32 %v684_v47, %v1036_v58  ;;  %773 = vmatprep.mubr.f32.mxu1 %v377_v46 }
 0x163   :  { %v685_v49 = vpop.f32.mrb[28].mxu0  ;;  %774 = vmatmul.mubr.f32.gmra.mrb[12].mxu1 %v380_v48 }
 0x164   :  { %v686_v50 = vpop.f32.mrb[29].mxu0 }
 0x165   :  { %v687_v51 = vadd.f32 %v686_v50, %v685_v49  ;;  %v688_v52 = vpop.f32.mrb[30].mxu0 }
 0x166   :  { %v689_v53 = vpop.f32.mrb[31].mxu0 }
 0x167   :  { %v385_v54 = vadd.f32 %v687_v51, %v1036_v58  ;;  %v690_v55 = vadd.f32 %v689_v53, %v688_v52 }
 0x169   :  { %v388_v56 = vadd.f32 %v690_v55, %v1036_v58  ;;  %776 = vmatprep.mubr.f32.mxu1 %v385_v54 }
 0x16b   :  { %777 = vmatmul.mubr.f32.gmra.mrb[14].mxu1 %v388_v56 }
 0x206   :  { %v757_v59 = vpop.f32.mrb[0].mxu1 }
 0x207   :  { %v486_v60 = vadd.f32 %v757_v59, %v626_v57  ;;  %v480_v61 = vpop.f32.mrb[1].mxu1 }
 0x208   :  { %v481_v62 = vadd.f32 %v626_v57, %v480_v61 }
 0x209   :  { %560 = vst [vmem:[#allocation8 + $0x8] sm:$0xff] %v486_v60 }
 0x20a   :  { %559 = vst [vmem:[#allocation8] sm:$0xff] %v481_v62 }
 0x20e   :  { %v760_v63 = vpop.f32.mrb[2].mxu1 }
 0x20f   :  { %v496_v0 = vadd.f32 %v760_v63, %v626_v57  ;;  %v490_v1 = vpop.f32.mrb[3].mxu1 }
 0x210   :  { %v491_v2 = vadd.f32 %v626_v57, %v490_v1 }
 0x211   :  { %562 = vst [vmem:[#allocation8 + $0x18] sm:$0xff] %v496_v0 }
 0x212   :  { %561 = vst [vmem:[#allocation8 + $0x10] sm:$0xff] %v491_v2 }
 0x216   :  { %v763_v3 = vpop.f32.mrb[4].mxu1 }
 0x217   :  { %v506_v58 = vadd.f32 %v763_v3, %v626_v57  ;;  %v500_v4 = vpop.f32.mrb[5].mxu1 }
 0x218   :  { %v501_v5 = vadd.f32 %v626_v57, %v500_v4 }
 0x219   :  { %564 = vst [vmem:[#allocation8 + $0x28] sm:$0xff] %v506_v58 }
 0x21a   :  { %563 = vst [vmem:[#allocation8 + $0x20] sm:$0xff] %v501_v5 }
 0x21e   :  { %v766_v6 = vpop.f32.mrb[6].mxu1 }
 0x21f   :  { %v516_v7 = vadd.f32 %v766_v6, %v626_v57  ;;  %v510_v8 = vpop.f32.mrb[7].mxu1 }
 0x220   :  { %v511_v9 = vadd.f32 %v626_v57, %v510_v8 }
 0x221   :  { %566 = vst [vmem:[#allocation8 + $0x38] sm:$0xff] %v516_v7 }
 0x222   :  { %565 = vst [vmem:[#allocation8 + $0x30] sm:$0xff] %v511_v9 }
 0x226   :  { %v769_v10 = vpop.f32.mrb[8].mxu1 }
 0x227   :  { %v526_v11 = vadd.f32 %v769_v10, %v626_v57  ;;  %v520_v12 = vpop.f32.mrb[9].mxu1 }
 0x228   :  { %v521_v13 = vadd.f32 %v626_v57, %v520_v12 }
 0x229   :  { %568 = vst [vmem:[#allocation8 + $0x48] sm:$0xff] %v526_v11 }
 0x22a   :  { %567 = vst [vmem:[#allocation8 + $0x40] sm:$0xff] %v521_v13 }
 0x22e   :  { %v772_v14 = vpop.f32.mrb[10].mxu1 }
 0x22f   :  { %v536_v15 = vadd.f32 %v772_v14, %v626_v57  ;;  %v530_v16 = vpop.f32.mrb[11].mxu1 }
 0x230   :  { %v531_v17 = vadd.f32 %v626_v57, %v530_v16 }
 0x231   :  { %570 = vst [vmem:[#allocation8 + $0x58] sm:$0xff] %v536_v15 }
 0x232   :  { %569 = vst [vmem:[#allocation8 + $0x50] sm:$0xff] %v531_v17 }
 0x236   :  { %v775_v18 = vpop.f32.mrb[12].mxu1 }
 0x237   :  { %v546_v19 = vadd.f32 %v775_v18, %v626_v57  ;;  %v540_v20 = vpop.f32.mrb[13].mxu1 }
 0x238   :  { %v541_v21 = vadd.f32 %v626_v57, %v540_v20 }
 0x239   :  { %572 = vst [vmem:[#allocation8 + $0x68] sm:$0xff] %v546_v19 }
 0x23a   :  { %571 = vst [vmem:[#allocation8 + $0x60] sm:$0xff] %v541_v21 }
 0x23e   :  { %v778_v22 = vpop.f32.mrb[14].mxu1 }
 0x23f   :  { %v556_v23 = vadd.f32 %v778_v22, %v626_v57  ;;  %v550_v24 = vpop.f32.mrb[15].mxu1 }
 0x240   :  { %v551_v25 = vadd.f32 %v626_v57, %v550_v24 }
 0x241   :  { %574 = vst [vmem:[#allocation8 + $0x78] sm:$0xff] %v556_v23 }
 0x242   :  { %573 = vst [vmem:[#allocation8 + $0x70] sm:$0xff] %v551_v25 }
 0x243   :  { %936 = shalt.err (!%p933_p0)
}
 0x244   :  { %s937_s12 = scalar_lea.hbm %s1077_s5, 2048 }
 0x245   :  { %p938_p1 = scmp.ne.s32.totalorder %s1077_s5, %s937_s12  ;;  %p941_p2 = scmp.lt.u32.totalorder %s937_s12, %s1077_s5 }
 0x247   :  { %p943_p3 = pnand %p941_p2, %p938_p1 }
 0x249   :  { %946 = shalt.err (!%p943_p3)
}
 0x24a   :  { %586 = dma.vmem_to_hbm [thread:$0]  %s581_s8, 2048, %s1077_s5, [#allocation4], %s957_s1, %s957_s1, %s958_s17  }
 0x24b   :  { %951 = dma.done.wait [#allocation4], 2048  }
 0x24c   :  { %952 = vsyncadd [#allocation4], 4294965248 }
 0x24d   :  { %590 = vsyncpa [#allocation3], 1 }
 0x24e   :  { %591 = vsyncpa [#allocation6], 1 }
 0x24f   :  { %592 = vsyncpa [#allocation4], 1 }

</bundles_post_ra>
